<compile_context>
chip_gen: v7x
topology: tpu7x:2x2x1
jax: 0.10.0
libtpu: 0.0.40
codegen_flags: <defaults>
</compile_context>

<pallas_src>
import functools

import jax
import jax.numpy as jnp
from jax.experimental import pallas as pl
from jax.experimental.pallas import tpu as pltpu

LANES = 128                 # lane width of a vreg
SUBLANES = 8                # sublane height of a vreg
_MAX_FALLBACK_LANE = 16384  # cap on the fallback lane-axis width


def _device_kind() -> str:
    try:
        return (jax.devices()[0].device_kind or "").lower()
    except Exception:
        return ""


def _default_num_shards(kind: str) -> int:
    # v7x has 2 TensorCores per chip; v5e/v6e have 1.  On single-TC chips a
    # second shard would just serialize (extra clamped duplicate DMA + extra
    # accumulator init/writeback), so keep 1 there.
    return 2 if "v7" in kind else 1


def _default_tile_rows(kind: str) -> int:
    # Rows of a 128-lane tile per grid step (per input, per pipeline buffer).
    if "v5" in kind:
        return 4096    # 2 MiB f32: v5e per-tile DMA already dwarfs step overhead
    if "v6" in kind:
        return 16384   # 8 MiB f32: plenty of headroom in 128 MiB physical VMEM
    return 8192        # v7x (64 MiB VMEM) and unknown chips: 4 MiB f32 tiles


def _choose_layout(shape):
    """Pick a zero-copy 2D (rows, lane) view of the 5-D input."""
    numel = 1
    for d in shape:
        numel *= int(d)
    if numel % LANES == 0:
        return numel // LANES, LANES
    # Rare fallback (numel not a multiple of 128): use the largest trailing-dim
    # product <= _MAX_FALLBACK_LANE as the lane axis so the reshape stays a
    # free bitcast (no jnp.pad, no prefix-slice copy).
    lane = int(shape[-1])
    suffix = 1
    for d in reversed(shape):
        suffix *= int(d)
        if suffix <= _MAX_FALLBACK_LANE:
            lane = suffix
    return numel // lane, lane


def _grid_cell_loss_kernel(gen_ref, tgt_ref, out_ref, acc_ref, *,
                           inner_steps, block_rows, total_rows, lane,
                           acc_rows, needs_mask, weight_fn):
    """One grid step: partial-reduce a (block_rows, lane) tile of (gen - tgt)*w."""
    p = pl.program_id(0)   # core shard ("parallel"; CORE_PARALLEL opt-in for v7x)
    i = pl.program_id(1)   # sequential reduction step within the shard

    @pl.when(i == 0)
    def _init():
        acc_ref[...] = jnp.zeros_like(acc_ref)

    # Inputs stay in their native dtype through the DMA; upcast here (in-kernel).
    gen = gen_ref[...].astype(jnp.float32)
    tgt = tgt_ref[...].astype(jnp.float32)
    diff = gen - tgt
    if weight_fn is not None:
        diff = diff * weight_fn(tgt)

    def partial_reduce(d):
        # Keep (sublane, lane) structure: pure VPU adds, XLU stays idle.
        if acc_rows == block_rows:
            return d
        return d.reshape(block_rows // acc_rows, acc_rows, lane).sum(axis=0)

    if needs_mask:
        # Gate the mask so only the genuinely partial block (or a clamped
        # duplicate block of an unbalanced last shard) pays for it.
        valid_rows = total_rows - (p * inner_steps + i) * block_rows

        @pl.when(valid_rows >= block_rows)
        def _full():
            acc_ref[...] += partial_reduce(diff)

        @pl.when(valid_rows < block_rows)
        def _ragged():
            row_ids = jax.lax.broadcasted_iota(jnp.int32, (block_rows, 1), 0)
            # Select (not multiply): garbage rows of a partial tile contribute
            # exactly 0 even if weight_fn produced NaN/Inf on them.
            masked = jnp.where(row_ids < valid_rows, diff, 0.0)
            acc_ref[...] += partial_reduce(masked)
    else:
        acc_ref[...] += partial_reduce(diff)

    @pl.when(i == inner_steps - 1)
    def _finalize():
        out_ref[...] = acc_ref[...]


def grid_cell_loss(generated_images, targets, weight_fn=None, *,
                   tile_rows=None, num_shards=None, core_parallel=False):
    """JAX/Pallas equivalent of GridCellLoss.forward.

    Args:
      generated_images: (B, T, C, H, W) array (mean generated frames).
      targets:          (B, T, C, H, W) array (ground-truth frames).
      weight_fn: optional traceable callable applied to targets.
      tile_rows: override rows-per-tile (>=16; mainly for testing).
      num_shards: override the leading core-shard grid axis (default: 2 on
        v7x, 1 on v5e/v6e/unknown).
      core_parallel: use pltpu.CORE_PARALLEL for the shard axis (v7x tuning).

    Returns:
      scalar float32 loss.
    """
    assert generated_images.shape == targets.shape, "shape mismatch"
    shape = targets.shape
    assert len(shape) == 5, "expected (B, T, C, H, W)"
    B, T, C, H, W = (int(s) for s in shape)
    numel = B * T * C * H * W
    # mean(diff / (T*H*W)) == sum(diff) / (numel * T * H * W)
    scale = 1.0 / (float(numel) * float(T) * float(H) * float(W))

    rows, lane = _choose_layout(shape)
    # Zero-copy bitcast reshapes; do NOT pre-cast to f32 on the wrapper side —
    # narrow inputs (e.g. bf16) should stream narrow through the DMA.
    g2 = generated_images.reshape(rows, lane)
    t2 = targets.reshape(rows, lane)

    kind = _device_kind()
    target_rows = int(tile_rows) if tile_rows is not None else _default_tile_rows(kind)
    # Keep tile bytes comparable when lane != 128, and keep the row count a
    # multiple of 16 so packed-sublane tiling (bf16/int8 inputs) is respected.
    block_rows = max(16, (target_rows * LANES) // max(lane, 1))
    block_rows = (block_rows // 16) * 16
    if block_rows >= rows:
        block_rows = rows            # single full-dim block: no masking needed

    n_blocks = pl.cdiv(rows, block_rows)
    n_shards = num_shards if num_shards is not None else _default_num_shards(kind)
    n_shards = max(1, min(int(n_shards), n_blocks))
    inner_steps = pl.cdiv(n_blocks, n_shards)
    needs_mask = (n_blocks * block_rows != rows) or (n_shards * inner_steps != n_blocks)

    acc_rows = SUBLANES if block_rows % SUBLANES == 0 else block_rows

    def row_block_map(p, i):
        # Clamp so the (possibly unbalanced) last shard's extra steps re-read a
        # valid block instead of DMA-ing out of bounds; the kernel masks their
        # contribution to zero.
        return (jnp.minimum(p * inner_steps + i, n_blocks - 1), 0)

    kernel = functools.partial(
        _grid_cell_loss_kernel,
        inner_steps=inner_steps,
        block_rows=block_rows,
        total_rows=rows,
        lane=lane,
        acc_rows=acc_rows,
        needs_mask=needs_mask,
        weight_fn=weight_fn,
    )

    g_item = jnp.dtype(generated_images.dtype).itemsize
    t_item = jnp.dtype(targets.dtype).itemsize
    in_tile_bytes = block_rows * lane * (g_item + t_item)   # both inputs, per buffer
    f32_tile_bytes = block_rows * lane * 4                  # in-kernel temporaries
    vmem_needed = 2 * in_tile_bytes + 6 * f32_tile_bytes + (8 << 20)
    vmem_cap = (48 << 20) if "v7" in kind else (100 << 20)  # v7x physical VMEM is 64 MiB
    vmem_limit = int(min(max(32 << 20, vmem_needed), vmem_cap))

    if core_parallel:
        # TODO(synk): verify on real v7x hardware that the shard axis lands on
        # both TensorCores with plain "parallel"; if it serializes, enable this
        # flag (CORE_PARALLEL) for the shard axis.
        semantics = (pltpu.CORE_PARALLEL, pltpu.ARBITRARY)
    else:
        semantics = ("parallel", "arbitrary")

    cost = pl.CostEstimate(
        flops=3 * numel,
        transcendentals=0,
        bytes_accessed=numel * (g_item + t_item) + n_shards * acc_rows * lane * 4,
    )

    partials = pl.pallas_call(
        kernel,
        out_shape=jax.ShapeDtypeStruct((n_shards, acc_rows, lane), jnp.float32),
        grid_spec=pltpu.PrefetchScalarGridSpec(
            num_scalar_prefetch=0,
            grid=(n_shards, inner_steps),
            in_specs=[
                pl.BlockSpec((block_rows, lane), row_block_map),
                pl.BlockSpec((block_rows, lane), row_block_map),
            ],
            out_specs=pl.BlockSpec((None, acc_rows, lane), lambda p, i: (p, 0, 0)),
            scratch_shapes=[pltpu.VMEM((acc_rows, lane), jnp.float32)],
        ),
        compiler_params=pltpu.CompilerParams(
            dimension_semantics=semantics,
            vmem_limit_bytes=vmem_limit,
        ),
        cost_estimate=cost,
    )(g2, t2)

    # Single cross-lane reduction of the small partials block + final scale.
    return jnp.sum(partials) * scale


def _reference(generated_images, targets, weight_fn=None):
    diff = generated_images - targets
    if weight_fn is not None:
        diff = diff * weight_fn(targets)
    T, H, W = targets.shape[1], targets.shape[3], targets.shape[4]
    diff = diff / (T * H * W)
    return jnp.mean(diff)


if __name__ == "__main__":
    key = jax.random.PRNGKey(0)
    k1, k2, k3, k4, k5, k6 = jax.random.split(key, 6)

    # (B, T, C, H, W) — generated mean predictions and ground-truth frames.
    B, T, C, H, W = 2, 8, 1, 16, 16
    generated = jax.random.normal(k1, (B, T, C, H, W), dtype=jnp.float32)
    targets = jax.random.normal(k2, (B, T, C, H, W), dtype=jnp.float32)

    # 1) Module default: weight_fn=None (single full-array tile, no masking).
    loss = grid_cell_loss(generated, targets)
    jax.block_until_ready(loss)
    ref = _reference(generated, targets)
    assert jnp.allclose(loss, ref, atol=1e-8, rtol=1e-4), (loss, ref)

    # 2) With a weight_fn (precipitation-style weighting), applied in-kernel.
    wfn = lambda y: jnp.clip(y, 0.0, 24.0) + 1.0
    loss_w = grid_cell_loss(generated, targets, weight_fn=wfn)
    jax.block_until_ready(loss_w)
    ref_w = _reference(generated, targets, weight_fn=wfn)
    assert jnp.allclose(loss_w, ref_w, atol=1e-8, rtol=1e-4), (loss_w, ref_w)

    # 3) Small tile + forced 2 shards: exercises multi-block, unbalanced-shard
    #    clamping and the gated partial-block mask (paths real v7x shapes hit).
    gen2 = jax.random.normal(k3, (2, 5, 1, 16, 32), dtype=jnp.float32)
    tgt2 = jax.random.normal(k4, (2, 5, 1, 16, 32), dtype=jnp.float32)
    loss2 = grid_cell_loss(gen2, tgt2, tile_rows=16, num_shards=2)
    jax.block_until_ready(loss2)
    ref2 = _reference(gen2, tgt2)
    assert jnp.allclose(loss2, ref2, atol=1e-8, rtol=1e-4), (loss2, ref2)

    # 4) numel not a multiple of 128: zero-copy suffix-flatten fallback
    #    (no jnp.pad, no prefix-slice copies).
    gen3 = jax.random.normal(k5, (2, 3, 1, 5, 7), dtype=jnp.float32)
    tgt3 = jax.random.normal(k6, (2, 3, 1, 5, 7), dtype=jnp.float32)
    loss3 = grid_cell_loss(gen3, tgt3, weight_fn=wfn)
    jax.block_until_ready(loss3)
    ref3 = _reference(gen3, tgt3, weight_fn=wfn)
    assert jnp.allclose(loss3, ref3, atol=1e-8, rtol=1e-4), (loss3, ref3)

    # 5) Larger run at the default (generation-aware) tile size: validates the
    #    big-tile multi-block hot path with native-dtype DMA + in-kernel weight.
    kb1, kb2 = jax.random.split(k1)
    genb = jax.random.normal(kb1, (4, 16, 1, 256, 256), dtype=jnp.float32)
    tgtb = jax.random.normal(kb2, (4, 16, 1, 256, 256), dtype=jnp.float32)
    lossb = grid_cell_loss(genb, tgtb, weight_fn=wfn)
    jax.block_until_ready(lossb)
    refb = _reference(genb, tgtb, weight_fn=wfn)
    assert jnp.allclose(lossb, refb, atol=1e-8, rtol=1e-4), (lossb, refb)

    print("KERNEL_OK")
</pallas_src>

<mosaic_0001>
module attributes {stable_mosaic.version = 11 : i64} {
  func.func @_grid_cell_loss_kernel(%arg0: i32, %arg1: i32, %arg2: memref<32x128xf32, #tpu.memory_space<vmem>>, %arg3: memref<32x128xf32, #tpu.memory_space<vmem>>, %arg4: memref<1x8x128xf32, #tpu.memory_space<vmem>>, %arg5: memref<8x128xf32, #tpu.memory_space<vmem>>) attributes {dimension_semantics = [#tpu.dimension_semantics<parallel>, #tpu.dimension_semantics<arbitrary>], iteration_bounds = array<i64: 1, 1>, scalar_prefetch = 0 : i64, scratch_operands = 1 : i64, tpu.core_type = #tpu.core_type<tc>, window_params = [{transform_indices = @transform_0, window_bounds = array<i64: 32, 128>}, {transform_indices = @transform_1, window_bounds = array<i64: 32, 128>}, {transform_indices = @transform_2, window_bounds = array<i64: 1, 8, 128>}]} {
    %c0_i32 = arith.constant 0 : i32
    %0 = arith.cmpi eq, %arg1, %c0_i32 : i32
    %1 = arith.extui %0 : i1 to i32
    %c0_i32_0 = arith.constant 0 : i32
    %2 = arith.cmpi ne, %1, %c0_i32_0 : i32
    scf.if %2 {
      %cst_10 = arith.constant 0.000000e+00 : f32
      %14 = vector.broadcast %cst_10 : f32 to vector<8x128xf32>
      %c0_11 = arith.constant 0 : index
      %c0_12 = arith.constant 0 : index
      %15 = vector.load %arg5[%c0_11, %c0_12] : memref<8x128xf32, #tpu.memory_space<vmem>>, vector<8x128xf32>
      tpu.vector_store %arg5[%c0_11, %c0_12], %14 {strides = array<i32>} : memref<8x128xf32, #tpu.memory_space<vmem>>, vector<8x128xf32>,
    } else {
    }
    %c0 = arith.constant 0 : index
    %c0_1 = arith.constant 0 : index
    %3 = vector.load %arg2[%c0, %c0_1] : memref<32x128xf32, #tpu.memory_space<vmem>>, vector<32x128xf32>
    %c0_2 = arith.constant 0 : index
    %c0_3 = arith.constant 0 : index
    %4 = vector.load %arg3[%c0_2, %c0_3] : memref<32x128xf32, #tpu.memory_space<vmem>>, vector<32x128xf32>
    %5 = arith.subf %3, %4 : vector<32x128xf32>
    %c0_4 = arith.constant 0 : index
    %c0_5 = arith.constant 0 : index
    %6 = vector.load %arg5[%c0_4, %c0_5] : memref<8x128xf32, #tpu.memory_space<vmem>>, vector<8x128xf32>
    %7 = vector.shape_cast %5 : vector<32x128xf32> to vector<4x8x128xf32>
    %cst = arith.constant dense<0.000000e+00> : vector<8x128xf32>
    %8 = vector.multi_reduction <add>, %7, %cst [0] : vector<4x8x128xf32> to vector<8x128xf32>
    %9 = arith.addf %6, %8 : vector<8x128xf32>
    %c0_6 = arith.constant 0 : index
    %c0_7 = arith.constant 0 : index
    %10 = vector.load %arg5[%c0_6, %c0_7] : memref<8x128xf32, #tpu.memory_space<vmem>>, vector<8x128xf32>
    tpu.vector_store %arg5[%c0_6, %c0_7], %9 {strides = array<i32>} : memref<8x128xf32, #tpu.memory_space<vmem>>, vector<8x128xf32>,
    %c0_i32_8 = arith.constant 0 : i32
    %11 = arith.cmpi eq, %arg1, %c0_i32_8 : i32
    %12 = arith.extui %11 : i1 to i32
    %c0_i32_9 = arith.constant 0 : i32
    %13 = arith.cmpi ne, %12, %c0_i32_9 : i32
    scf.if %13 {
      %c0_10 = arith.constant 0 : index
      %c0_11 = arith.constant 0 : index
      %14 = vector.load %arg5[%c0_10, %c0_11] : memref<8x128xf32, #tpu.memory_space<vmem>>, vector<8x128xf32>
      %c0_12 = arith.constant 0 : index
      %c0_13 = arith.constant 0 : index
      %c0_14 = arith.constant 0 : index
      %15 = vector.load %arg4[%c0_12, %c0_13, %c0_14] : memref<1x8x128xf32, #tpu.memory_space<vmem>>, vector<1x8x128xf32>
      %16 = vector.shape_cast %15 : vector<1x8x128xf32> to vector<8x128xf32>
      %17 = vector.shape_cast %14 : vector<8x128xf32> to vector<1x8x128xf32>
      tpu.vector_store %arg4[%c0_12, %c0_13, %c0_14], %17 {strides = array<i32>} : memref<1x8x128xf32, #tpu.memory_space<vmem>>, vector<1x8x128xf32>,
    } else {
    }
    return
  }
  func.func @transform_0(%arg0: i32, %arg1: i32) -> (i32, i32) {
    %c1_i32 = arith.constant 1 : i32
    %0 = arith.muli %arg0, %c1_i32 : i32
    %1 = arith.addi %0, %arg1 : i32
    %c0_i32 = arith.constant 0 : i32
    %2 = arith.minsi %1, %c0_i32 : i32
    %c0_i32_0 = arith.constant 0 : i32
    %c0_i32_1 = arith.constant 0 : i32
    return %2, %c0_i32_0 : i32, i32
  }
  func.func @transform_1(%arg0: i32, %arg1: i32) -> (i32, i32) {
    %c1_i32 = arith.constant 1 : i32
    %0 = arith.muli %arg0, %c1_i32 : i32
    %1 = arith.addi %0, %arg1 : i32
    %c0_i32 = arith.constant 0 : i32
    %2 = arith.minsi %1, %c0_i32 : i32
    %c0_i32_0 = arith.constant 0 : i32
    %c0_i32_1 = arith.constant 0 : i32
    return %2, %c0_i32_0 : i32, i32
  }
  func.func @transform_2(%arg0: i32, %arg1: i32) -> (i32, i32, i32) {
    %c0_i32 = arith.constant 0 : i32
    %c0_i32_0 = arith.constant 0 : i32
    %c0_i32_1 = arith.constant 0 : i32
    return %arg0, %c0_i32, %c0_i32_0 : i32, i32, i32
  }
}

</mosaic_0001>

<bundles_post_ra>
// kernel: tpu_custom_call.1
= control target key start
LH: loop header
LB: loop body
LE: loop exit
PB: predicated region body
PF: predicated region fallthrough
CT: control target
= control target key end

     0   :  { %7 = vsyncpa [#allocation4], 0  ;;  %s241_s0 = inlined_call_operand.hbm [shape: f32[32,128], index: 0, kind: input, shape index: {}]   ;;  %s242_s1 = inlined_call_operand.hbm [shape: f32[32,128], index: 1, kind: input, shape index: {}]   ;;  %s243_s2 = inlined_call_operand.hbm [shape: f32[1,8,128], index: 2, kind: output, shape index: {}]  }
   0x1   :  { %8 = vsyncpa [#allocation7], 0 }
   0x2   :  { %9 = vsyncpa [#allocation5], 0  ;;  %s185_s9 = smov [#allocation3]   ;;  %s113_s13 = scalar_lea.hbm %s241_s0, 512 }
   0x3   :  { %s21_s10 = sshll.u32 %s185_s9, 4  ;;  %p114_p0 = scmp.ne.s32.totalorder %s241_s0, %s113_s13  ;;  %s22_s10 = int_to_ptr.vmem [resolvable:$true] %s21_s10 }
   0x4   :  { %p117_p1 = scmp.lt.u32.totalorder %s113_s13, %s241_s0 }
   0x6   :  { %p119_p2 = pnand %p117_p1, %p114_p0 }
   0x8   :  { %122 = shalt.err (!%p119_p2)
}
   0x9   :  { %s123_s18 = scalar_lea.vmem %s22_s10, 512  ;;  %p128_p4 = scmp.lt.s32.totalorder %s22_s10, %s22_s10 }
   0xa   :  { %p124_p3 = scmp.ne.s32.totalorder %s22_s10, %s123_s18  ;;  %p129_p5 = scmp.lt.s32.totalorder %s123_s18, %s123_s18 }
   0xc   :  { %p130_p6 = por %p129_p5, %p128_p4 }
   0xe   :  { %p131_p7 = pnand %p130_p6, %p124_p3 }
  0x10   :  { %134 = shalt.err (!%p131_p7)
}
  0x11   :  { %s186_s19 = smov 128   ;;  %s187_s20 = smov 8  }
  0x12   :  { %27 = dma.hbm_to_vmem [thread:$0]  %s241_s0, 512, %s22_s10, [#allocation4], %s186_s19, %s186_s19, %s187_s20  }
  0x13   :  { %s188_s23 = smov [#allocation6]   ;;  %s135_s27 = scalar_lea.hbm %s242_s1, 512 }
  0x14   :  { %s39_s24 = sshll.u32 %s188_s23, 4  ;;  %p136_p8 = scmp.ne.s32.totalorder %s242_s1, %s135_s27  ;;  %s40_s24 = int_to_ptr.vmem [resolvable:$true] %s39_s24 }
  0x15   :  { %p139_p9 = scmp.lt.u32.totalorder %s135_s27, %s242_s1 }
  0x17   :  { %p141_p10 = pnand %p139_p9, %p136_p8 }
  0x19   :  { %144 = shalt.err (!%p141_p10)
}
  0x1a   :  { %s145_s4 = scalar_lea.vmem %s40_s24, 512  ;;  %p150_p12 = scmp.lt.s32.totalorder %s40_s24, %s40_s24 }
  0x1b   :  { %p146_p11 = scmp.ne.s32.totalorder %s40_s24, %s145_s4  ;;  %p151_p13 = scmp.lt.s32.totalorder %s145_s4, %s145_s4 }
  0x1d   :  { %p152_p0 = por %p151_p13, %p150_p12 }
  0x1f   :  { %p153_p1 = pnand %p152_p0, %p146_p11 }
  0x21   :  { %156 = shalt.err (!%p153_p1)
}
  0x22   :  { %45 = dma.hbm_to_vmem [thread:$0]  %s242_s1, 512, %s40_s24, [#allocation7], %s186_s19, %s186_s19, %s187_s20  }
  0x23   :  { %179 = dma.done.wait [#allocation4], 512  }
  0x24   :  { %180 = vsyncadd [#allocation4], 4294966784 }
  0x25   :  { %181 = dma.done.wait [#allocation7], 512  }
  0x26   :  { %182 = vsyncadd [#allocation7], 4294966784  ;;  %v65_v0 = vld [vmem:[#allocation3] sm:$0xff]  ;;  %v66_v1 = vld [vmem:[#allocation3 + $0x8] sm:$0xff]  ;;  %s189_s6 = smov [#allocation8]  }
  0x27   :  { %v67_v2 = vld [vmem:[#allocation3 + $0x10] sm:$0xff]  ;;  %v68_v3 = vld [vmem:[#allocation3 + $0x18] sm:$0xff]  ;;  %v69_v4 = vld [vmem:[#allocation6] sm:$0xff]  ;;  %s94_s7 = sshll.u32 %s189_s6, 4  ;;  %s95_s7 = int_to_ptr.vmem [resolvable:$true] %s94_s7 }
  0x28   :  { %v70_v5 = vld [vmem:[#allocation6 + $0x8] sm:$0xff]  ;;  %v71_v6 = vld [vmem:[#allocation6 + $0x10] sm:$0xff]  ;;  %v72_v7 = vld [vmem:[#allocation6 + $0x18] sm:$0xff]  ;;  %v73_v8 = vsub.f32 %v65_v0, %v69_v4  ;;  %s157_s1 = scalar_lea.vmem %s95_s7, 128  ;;  %p162_p3 = scmp.lt.s32.totalorder %s95_s7, %s95_s7 }
  0x29   :  { %v74_v9 = vsub.f32 %v66_v1, %v70_v5  ;;  %v75_v10 = vsub.f32 %v67_v2, %v71_v6  ;;  %v76_v11 = vsub.f32 %v68_v3, %v72_v7  ;;  %p158_p2 = scmp.ne.s32.totalorder %s95_s7, %s157_s1  ;;  %p163_p4 = scmp.lt.s32.totalorder %s157_s1, %s157_s1 }
  0x2b   :  { %v78_v12 = vadd.f32 %v74_v9, %v73_v8  ;;  %p164_p5 = por %p163_p4, %p162_p3 }
  0x2d   :  { %v79_v13 = vadd.f32 %v78_v12, %v75_v10  ;;  %p165_p6 = pnand %p164_p5, %p158_p2 }
  0x2f   :  { %v80_v14 = vadd.f32 %v79_v13, %v76_v11 }
  0x31   :  { %87 = vst [vmem:[#allocation8] sm:$0xff] %v80_v14 }
  0x32   :  { %168 = shalt.err (!%p165_p6)
}
  0x33   :  { %s169_s10 = scalar_lea.hbm %s243_s2, 128 }
  0x34   :  { %p170_p7 = scmp.ne.s32.totalorder %s243_s2, %s169_s10  ;;  %p173_p8 = scmp.lt.u32.totalorder %s169_s10, %s243_s2 }
  0x36   :  { %p175_p9 = pnand %p173_p8, %p170_p7 }
  0x38   :  { %178 = shalt.err (!%p175_p9)
}
  0x39   :  { %97 = dma.vmem_to_hbm [thread:$0]  %s95_s7, 128, %s243_s2, [#allocation5]  }
  0x3a   :  { %183 = dma.done.wait [#allocation5], 128  }
  0x3b   :  { %184 = vsyncadd [#allocation5], 4294967168 }
  0x3c   :  { %101 = vsyncpa [#allocation4], 1 }
  0x3d   :  { %102 = vsyncpa [#allocation7], 1 }
  0x3e   :  { %103 = vsyncpa [#allocation5], 1 }

</bundles_post_ra>
